<compile_context>
chip_gen: v5e
topology: v5e:2x2
jax: 0.10.0
libtpu: 0.0.40
codegen_flags: <defaults>
</compile_context>

<pallas_src>
import jax
import jax.numpy as jnp
from jax.experimental import pallas as pl
from jax.experimental.pallas import tpu as pltpu


def gru_seq_kernel(ids_ref,                 # SMEM (T, B) int32   -- scalar-prefetched token ids
                   h0_ref,                  # VMEM (B, H)  f32    -- initial hidden state
                   gi_tab_ref,              # VMEM (V, 3H) f32    -- emb @ W_i^T + folded biases
                   wh_ref,                  # VMEM (H, 3H) bf16   -- W_h^T, columns [r|z|n]
                   bh_ref,                  # VMEM (1, 3H) f32    -- [0 | 0 | b_hn]
                   wdec_ref,                # VMEM (H, Op) bf16   -- decoder W^T, lane-padded
                   bdec_ref,                # VMEM (1, Op) f32    -- decoder bias, lane-padded
                   logits_ref,              # VMEM (1, B, Op) f32 -- this step's logits block
                   h_ref):                  # VMEM (B, H)  f32    -- resident hidden (written back once)
    t = pl.program_id(0)
    B, H = h0_ref.shape
    V = gi_tab_ref.shape[0]

    @pl.when(t == 0)
    def _():
        h_ref[...] = h0_ref[...]

    # --- This step's token ids: B scalar SMEM reads broadcast into a (B, 1) column. ---
    rows = jax.lax.broadcasted_iota(jnp.int32, (B, 1), 0)
    ids_col = jnp.zeros((B, 1), jnp.int32)
    for b in range(B):                                          # B is small & static
        ids_col = jnp.where(rows == b, ids_ref[t, b], ids_col)

    # --- Fused embedding + input-gate path: one-hot (B,V) @ gi_table (V,3H), f32 gather-matmul. ---
    onehot = (jax.lax.broadcasted_iota(jnp.int32, (B, V), 1) == ids_col)
    gi = jnp.dot(onehot.astype(gi_tab_ref.dtype), gi_tab_ref[...],
                 preferred_element_type=jnp.float32)            # (B, 3H): x@W_i^T + b_i (+ b_hr,b_hz)
    # embedding_dropout(p=0) is identity.

    # --- Hidden-gate path: single fused matmul + [0 | 0 | b_hn]. ---
    h = h_ref[...]                                              # (B, H) f32
    gh = jnp.dot(h.astype(jnp.bfloat16), wh_ref[...],
                 preferred_element_type=jnp.float32) + bh_ref[...]   # (B, 3H)

    # PyTorch GRU cell (elementwise math kept in f32):
    #   r  = sigmoid(xW_ir + b_ir + hW_hr + b_hr)      (b_ir+b_hr folded into gi_table)
    #   z  = sigmoid(xW_iz + b_iz + hW_hz + b_hz)      (b_iz+b_hz folded into gi_table)
    #   n  = tanh   (xW_in + b_in + r * (hW_hn + b_hn))
    #   h' = (1 - z) * n + z * h
    r = jax.nn.sigmoid(gi[:, 0 * H:1 * H] + gh[:, 0 * H:1 * H])
    z = jax.nn.sigmoid(gi[:, 1 * H:2 * H] + gh[:, 1 * H:2 * H])
    n = jnp.tanh(gi[:, 2 * H:3 * H] + r * gh[:, 2 * H:3 * H])
    h_new = (1.0 - z) * n + z * h
    h_ref[...] = h_new           # stays VMEM-resident; single HBM writeback after the last step
    # state_dropout(p=0) is identity.

    # --- Decoder: lane-dense (B, Op) store, Op = 128-padded output width. ---
    logits_ref[0, :, :] = (jnp.dot(h_new.astype(jnp.bfloat16), wdec_ref[...],
                                   preferred_element_type=jnp.float32)
                           + bdec_ref[...])


def pack_params(params, lane=128):
    """One-time repack of PyTorch-shaped params into kernel-ready layout (off the forward path)."""
    H = params["w_hh"].shape[1]
    O = params["w_dec"].shape[0]
    Op = pl.cdiv(O, lane) * lane

    emb = jnp.asarray(params["embedding"], jnp.float32)          # (V, H)
    w_i = jnp.asarray(params["w_ih"], jnp.float32).T             # (H, 3H), columns [r|z|n]
    b_i = jnp.asarray(params["b_ih"], jnp.float32)               # (3H,)
    b_h = jnp.asarray(params["b_hh"], jnp.float32)                # (3H,)

    # Fold b_hr, b_hz into the x-path table (they are purely additive pre-sigmoid).
    # b_hn must stay on the h path: it is scaled by r before entering tanh.
    b_fold = jnp.concatenate([b_h[:2 * H], jnp.zeros((H,), jnp.float32)])
    gi_table = emb @ w_i + (b_i + b_fold)[None, :]                # (V, 3H) f32, exact gather source
    bh_pack = jnp.concatenate([jnp.zeros((2 * H,), jnp.float32), b_h[2 * H:]])[None, :]  # (1, 3H)

    w_dec_t = jnp.asarray(params["w_dec"], jnp.float32).T         # (H, O)
    w_dec_p = jnp.zeros((H, Op), jnp.float32).at[:, :O].set(w_dec_t).astype(jnp.bfloat16)
    b_dec_p = jnp.zeros((1, Op), jnp.float32).at[:, :O].set(
        jnp.asarray(params["b_dec"], jnp.float32)[None, :])

    return {
        "gi_table": gi_table,                                                       # (V, 3H) f32
        "w_h": jnp.asarray(params["w_hh"], jnp.float32).T.astype(jnp.bfloat16),      # (H, 3H) bf16
        "bh_pack": bh_pack,                                                         # (1, 3H) f32
        "w_dec": w_dec_p,                                                           # (H, Op) bf16
        "b_dec": b_dec_p,                                                           # (1, Op) f32
        "hidden_size": H,
        "out_size": O,
    }


def standard_rnn_forward_seq(token_ids, hidden, packed):
    """token_ids: (T, B) int32; hidden: (1, B, H) f32.
    Applies the module's forward() once per step inside ONE pallas_call grid.
    Returns (logits (T, B, O), hidden' (1, B, H))."""
    token_ids = jnp.asarray(token_ids, jnp.int32)
    T, B = token_ids.shape
    H = packed["hidden_size"]
    O = packed["out_size"]
    Op = packed["b_dec"].shape[1]
    V = packed["gi_table"].shape[0]
    assert hidden.shape == (1, B, H), "kernel assumes n_layers == 1"
    h0 = hidden.reshape(B, H).astype(jnp.float32)

    def resident(shape):
        # Full-array block with a constant block index -> DMA'd once, stays VMEM-resident.
        zeros = (0,) * len(shape)
        return pl.BlockSpec(shape, lambda t, ids, _z=zeros: _z)

    grid_spec = pltpu.PrefetchScalarGridSpec(
        num_scalar_prefetch=1,                      # token ids -> SMEM, available to index_maps
        grid=(T,),
        in_specs=[
            resident((B, H)),                       # h0
            resident((V, 3 * H)),                   # gi_table
            resident((H, 3 * H)),                   # w_h
            resident((1, 3 * H)),                   # bh_pack
            resident((H, Op)),                      # w_dec (lane-padded)
            resident((1, Op)),                      # b_dec (lane-padded)
        ],
        out_specs=(
            pl.BlockSpec((1, B, Op), lambda t, ids: (t, 0, 0)),   # per-step logits (lane-dense)
            pl.BlockSpec((B, H), lambda t, ids: (0, 0)),          # final hidden (resident)
        ),
    )

    logits_p, h_final = pl.pallas_call(
        gru_seq_kernel,
        grid_spec=grid_spec,
        out_shape=(jax.ShapeDtypeStruct((T, B, Op), jnp.float32),
                   jax.ShapeDtypeStruct((B, H), jnp.float32)),
        compiler_params=pltpu.CompilerParams(dimension_semantics=("arbitrary",)),
    )(token_ids, h0, packed["gi_table"], packed["w_h"], packed["bh_pack"],
      packed["w_dec"], packed["b_dec"])

    return logits_p[:, :, :O], h_final.reshape(1, B, H)


def standard_rnn_forward(token_ids, hidden, packed):
    """Exact analogue of StandardRNN.forward: token_ids (B,), hidden (1, B, H)."""
    logits, h = standard_rnn_forward_seq(jnp.asarray(token_ids, jnp.int32)[None, :], hidden, packed)
    return logits[0], h


def init_params(key, vocab_size, hidden_size, output_size):
    """Deterministic synthetic parameters matching PyTorch shapes (GRU, n_layers=1)."""
    ks = jax.random.split(key, 7)
    H, V, O = hidden_size, vocab_size, output_size
    bound = 1.0 / jnp.sqrt(jnp.asarray(H, jnp.float32))
    u = lambda k, shape: jax.random.uniform(k, shape, jnp.float32, -bound, bound)
    return {
        "embedding": jax.random.normal(ks[0], (V, H), jnp.float32),   # nn.Embedding ~ N(0,1)
        "w_ih": u(ks[1], (3 * H, H)),   # gate order: r, z, n (PyTorch convention)
        "w_hh": u(ks[2], (3 * H, H)),
        "b_ih": u(ks[3], (3 * H,)),
        "b_hh": u(ks[4], (3 * H,)),
        "w_dec": u(ks[5], (O, H)),
        "b_dec": u(ks[6], (O,)),
    }


def reference_forward_seq(token_ids, hidden, params):
    """Pure-JAX f32 reference: StandardRNN.forward applied once per row of token_ids."""
    emb, w_ih, w_hh = params["embedding"], params["w_ih"], params["w_hh"]
    b_ih, b_hh, w_dec, b_dec = params["b_ih"], params["b_hh"], params["w_dec"], params["b_dec"]
    H = w_hh.shape[1]
    h = hidden[0]
    outs = []
    for t in range(token_ids.shape[0]):
        x = emb[token_ids[t]]
        gi = x @ w_ih.T + b_ih
        gh = h @ w_hh.T + b_hh
        r = jax.nn.sigmoid(gi[:, :H] + gh[:, :H])
        z = jax.nn.sigmoid(gi[:, H:2 * H] + gh[:, H:2 * H])
        n = jnp.tanh(gi[:, 2 * H:] + r * gh[:, 2 * H:])
        h = (1.0 - z) * n + z * h
        outs.append(h @ w_dec.T + b_dec)
    return jnp.stack(outs), h[None]


if __name__ == "__main__":
    key = jax.random.PRNGKey(0)
    k_params, k_tokens = jax.random.split(key)

    vocab_size = 16      # input_size (== n_characters)
    hidden_size = 32
    output_size = 16
    batch_size = 8
    seq_len = 8          # decode steps folded into one pallas_call grid
    n_layers = 1

    params = init_params(k_params, vocab_size, hidden_size, output_size)
    packed = pack_params(params)                 # one-time repack, off the forward path

    token_ids = jax.random.randint(k_tokens, (seq_len, batch_size), 0, vocab_size, jnp.int32)
    hidden = jnp.zeros((n_layers, batch_size, hidden_size), jnp.float32)   # init_hidden

    logits, new_hidden = standard_rnn_forward_seq(token_ids, hidden, packed)
    jax.block_until_ready((logits, new_hidden))

    assert logits.shape == (seq_len, batch_size, output_size)
    assert new_hidden.shape == (n_layers, batch_size, hidden_size)
    assert bool(jnp.all(jnp.isfinite(logits))) and bool(jnp.all(jnp.isfinite(new_hidden)))

    # bf16 matmul operands vs the pure-f32 reference -> small numerical drift expected.
    ref_logits, ref_hidden = reference_forward_seq(token_ids, hidden, params)
    max_logit_err = float(jnp.max(jnp.abs(logits - ref_logits)))
    max_h_err = float(jnp.max(jnp.abs(new_hidden - ref_hidden)))
    assert max_logit_err < 0.15 and max_h_err < 0.15, (max_logit_err, max_h_err)

    print("KERNEL_OK")
</pallas_src>

<mosaic_0001>
module attributes {stable_mosaic.version = 11 : i64} {
  func.func @gru_seq_kernel(%arg0: i32, %arg1: memref<8x8xi32, #tpu.memory_space<smem>>, %arg2: memref<8x32xf32, #tpu.memory_space<vmem>>, %arg3: memref<16x96xf32, #tpu.memory_space<vmem>>, %arg4: memref<32x96xbf16, #tpu.memory_space<vmem>>, %arg5: memref<1x96xf32, #tpu.memory_space<vmem>>, %arg6: memref<32x128xbf16, #tpu.memory_space<vmem>>, %arg7: memref<1x128xf32, #tpu.memory_space<vmem>>, %arg8: memref<1x8x128xf32, #tpu.memory_space<vmem>>, %arg9: memref<8x32xf32, #tpu.memory_space<vmem>>) attributes {dimension_semantics = [#tpu.dimension_semantics<arbitrary>], iteration_bounds = array<i64: 8>, scalar_prefetch = 1 : i64, scratch_operands = 0 : i64, tpu.core_type = #tpu.core_type<tc>, window_params = [{pipeline_mode = #tpu.pipeline_mode<synchronous>, transform_indices = @transform_0, window_bounds = array<i64: 8, 32>}, {pipeline_mode = #tpu.pipeline_mode<synchronous>, transform_indices = @transform_1, window_bounds = array<i64: 16, 96>}, {pipeline_mode = #tpu.pipeline_mode<synchronous>, transform_indices = @transform_2, window_bounds = array<i64: 32, 96>}, {pipeline_mode = #tpu.pipeline_mode<synchronous>, transform_indices = @transform_3, window_bounds = array<i64: 1, 96>}, {pipeline_mode = #tpu.pipeline_mode<synchronous>, transform_indices = @transform_4, window_bounds = array<i64: 32, 128>}, {pipeline_mode = #tpu.pipeline_mode<synchronous>, transform_indices = @transform_5, window_bounds = array<i64: 1, 128>}, {transform_indices = @transform_6, window_bounds = array<i64: 1, 8, 128>}, {pipeline_mode = #tpu.pipeline_mode<synchronous>, transform_indices = @transform_7, window_bounds = array<i64: 8, 32>}]} {
    %c0_i32 = arith.constant 0 : i32
    %0 = arith.cmpi eq, %arg0, %c0_i32 : i32
    %1 = arith.extui %0 : i1 to i32
    %c0_i32_0 = arith.constant 0 : i32
    %2 = arith.cmpi ne, %1, %c0_i32_0 : i32
    scf.if %2 {
      %c0_25 = arith.constant 0 : index
      %c0_26 = arith.constant 0 : index
      %103 = vector.load %arg2[%c0_25, %c0_26] : memref<8x32xf32, #tpu.memory_space<vmem>>, vector<8x32xf32>
      %c0_27 = arith.constant 0 : index
      %c0_28 = arith.constant 0 : index
      %104 = vector.load %arg9[%c0_27, %c0_28] : memref<8x32xf32, #tpu.memory_space<vmem>>, vector<8x32xf32>
      tpu.vector_store %arg9[%c0_27, %c0_28], %103 {strides = array<i32>} : memref<8x32xf32, #tpu.memory_space<vmem>>, vector<8x32xf32>,
    } else {
    }
    %3 = tpu.iota {dimensions = array<i32: 0>} : vector<8x1xi32>
    %c0_i32_1 = arith.constant 0 : i32
    %4 = vector.broadcast %c0_i32_1 : i32 to vector<8x1xi32>
    %c0_i32_2 = arith.constant 0 : i32
    %5 = vector.broadcast %c0_i32_2 : i32 to vector<8x1xi32>
    %6 = arith.cmpi eq, %3, %5 : vector<8x1xi32>
    %7 = arith.index_cast %arg0 : i32 to index
    %c0 = arith.constant 0 : index
    %8 = memref.load %arg1[%7, %c0] : memref<8x8xi32, #tpu.memory_space<smem>>
    %9 = vector.broadcast %8 : i32 to vector<8x1xi32>
    %10 = arith.select %6, %9, %4 : vector<8x1xi1>, vector<8x1xi32>
    %c1_i32 = arith.constant 1 : i32
    %11 = vector.broadcast %c1_i32 : i32 to vector<8x1xi32>
    %12 = arith.cmpi eq, %3, %11 : vector<8x1xi32>
    %13 = arith.index_cast %arg0 : i32 to index
    %c1 = arith.constant 1 : index
    %14 = memref.load %arg1[%13, %c1] : memref<8x8xi32, #tpu.memory_space<smem>>
    %15 = vector.broadcast %14 : i32 to vector<8x1xi32>
    %16 = arith.select %12, %15, %10 : vector<8x1xi1>, vector<8x1xi32>
    %c2_i32 = arith.constant 2 : i32
    %17 = vector.broadcast %c2_i32 : i32 to vector<8x1xi32>
    %18 = arith.cmpi eq, %3, %17 : vector<8x1xi32>
    %19 = arith.index_cast %arg0 : i32 to index
    %c2 = arith.constant 2 : index
    %20 = memref.load %arg1[%19, %c2] : memref<8x8xi32, #tpu.memory_space<smem>>
    %21 = vector.broadcast %20 : i32 to vector<8x1xi32>
    %22 = arith.select %18, %21, %16 : vector<8x1xi1>, vector<8x1xi32>
    %c3_i32 = arith.constant 3 : i32
    %23 = vector.broadcast %c3_i32 : i32 to vector<8x1xi32>
    %24 = arith.cmpi eq, %3, %23 : vector<8x1xi32>
    %25 = arith.index_cast %arg0 : i32 to index
    %c3 = arith.constant 3 : index
    %26 = memref.load %arg1[%25, %c3] : memref<8x8xi32, #tpu.memory_space<smem>>
    %27 = vector.broadcast %26 : i32 to vector<8x1xi32>
    %28 = arith.select %24, %27, %22 : vector<8x1xi1>, vector<8x1xi32>
    %c4_i32 = arith.constant 4 : i32
    %29 = vector.broadcast %c4_i32 : i32 to vector<8x1xi32>
    %30 = arith.cmpi eq, %3, %29 : vector<8x1xi32>
    %31 = arith.index_cast %arg0 : i32 to index
    %c4 = arith.constant 4 : index
    %32 = memref.load %arg1[%31, %c4] : memref<8x8xi32, #tpu.memory_space<smem>>
    %33 = vector.broadcast %32 : i32 to vector<8x1xi32>
    %34 = arith.select %30, %33, %28 : vector<8x1xi1>, vector<8x1xi32>
    %c5_i32 = arith.constant 5 : i32
    %35 = vector.broadcast %c5_i32 : i32 to vector<8x1xi32>
    %36 = arith.cmpi eq, %3, %35 : vector<8x1xi32>
    %37 = arith.index_cast %arg0 : i32 to index
    %c5 = arith.constant 5 : index
    %38 = memref.load %arg1[%37, %c5] : memref<8x8xi32, #tpu.memory_space<smem>>
    %39 = vector.broadcast %38 : i32 to vector<8x1xi32>
    %40 = arith.select %36, %39, %34 : vector<8x1xi1>, vector<8x1xi32>
    %c6_i32 = arith.constant 6 : i32
    %41 = vector.broadcast %c6_i32 : i32 to vector<8x1xi32>
    %42 = arith.cmpi eq, %3, %41 : vector<8x1xi32>
    %43 = arith.index_cast %arg0 : i32 to index
    %c6 = arith.constant 6 : index
    %44 = memref.load %arg1[%43, %c6] : memref<8x8xi32, #tpu.memory_space<smem>>
    %45 = vector.broadcast %44 : i32 to vector<8x1xi32>
    %46 = arith.select %42, %45, %40 : vector<8x1xi1>, vector<8x1xi32>
    %c7_i32 = arith.constant 7 : i32
    %47 = vector.broadcast %c7_i32 : i32 to vector<8x1xi32>
    %48 = arith.cmpi eq, %3, %47 : vector<8x1xi32>
    %49 = arith.index_cast %arg0 : i32 to index
    %c7 = arith.constant 7 : index
    %50 = memref.load %arg1[%49, %c7] : memref<8x8xi32, #tpu.memory_space<smem>>
    %51 = vector.broadcast %50 : i32 to vector<8x1xi32>
    %52 = arith.select %48, %51, %46 : vector<8x1xi1>, vector<8x1xi32>
    %53 = tpu.iota {dimensions = array<i32: 1>} : vector<8x16xi32>
    %54 = vector.broadcast %52 : vector<8x1xi32> to vector<8x16xi32>
    %55 = arith.cmpi eq, %53, %54 : vector<8x16xi32>
    %56 = arith.extui %55 : vector<8x16xi1> to vector<8x16xi32>
    %57 = arith.sitofp %56 : vector<8x16xi32> to vector<8x16xf32>
    %c0_3 = arith.constant 0 : index
    %c0_4 = arith.constant 0 : index
    %58 = vector.load %arg3[%c0_3, %c0_4] : memref<16x96xf32, #tpu.memory_space<vmem>>, vector<16x96xf32>
    %cst = arith.constant dense<0.000000e+00> : vector<8x96xf32>
    %59 = tpu.matmul %57, %58, %cst {dimension_numbers = #tpu.dot_dimension_numbers<[1], [0], [0], [1], [0, 0, 1, 1], [], []>} : vector<8x16xf32>, vector<16x96xf32>, vector<8x96xf32> -> vector<8x96xf32>
    %c0_5 = arith.constant 0 : index
    %c0_6 = arith.constant 0 : index
    %60 = vector.load %arg9[%c0_5, %c0_6] : memref<8x32xf32, #tpu.memory_space<vmem>>, vector<8x32xf32>
    %61 = arith.truncf %60 : vector<8x32xf32> to vector<8x32xbf16>
    %c0_7 = arith.constant 0 : index
    %c0_8 = arith.constant 0 : index
    %62 = vector.load %arg4[%c0_7, %c0_8] : memref<32x96xbf16, #tpu.memory_space<vmem>>, vector<32x96xbf16>
    %cst_9 = arith.constant dense<0.000000e+00> : vector<8x96xf32>
    %63 = tpu.matmul %61, %62, %cst_9 {dimension_numbers = #tpu.dot_dimension_numbers<[1], [0], [0], [1], [0, 0, 1, 1], [], []>} : vector<8x32xbf16>, vector<32x96xbf16>, vector<8x96xf32> -> vector<8x96xf32>
    %c0_10 = arith.constant 0 : index
    %c0_11 = arith.constant 0 : index
    %64 = vector.load %arg5[%c0_10, %c0_11] : memref<1x96xf32, #tpu.memory_space<vmem>>, vector<1x96xf32>
    %65 = vector.broadcast %64 : vector<1x96xf32> to vector<8x96xf32>
    %66 = arith.addf %63, %65 : vector<8x96xf32>
    %67 = vector.extract_strided_slice %59 {offsets = [0, 0], sizes = [8, 32], strides = [1, 1]} : vector<8x96xf32> to vector<8x32xf32>
    %68 = vector.extract_strided_slice %66 {offsets = [0, 0], sizes = [8, 32], strides = [1, 1]} : vector<8x96xf32> to vector<8x32xf32>
    %69 = arith.addf %67, %68 : vector<8x32xf32>
    %70 = arith.negf %69 : vector<8x32xf32>
    %71 = math.exp %70 : vector<8x32xf32>
    %cst_12 = arith.constant 1.000000e+00 : f32
    %72 = vector.broadcast %cst_12 : f32 to vector<8x32xf32>
    %73 = arith.addf %72, %71 : vector<8x32xf32>
    %74 = arith.divf %72, %73 : vector<8x32xf32>
    %75 = vector.extract_strided_slice %59 {offsets = [0, 32], sizes = [8, 32], strides = [1, 1]} : vector<8x96xf32> to vector<8x32xf32>
    %76 = vector.extract_strided_slice %66 {offsets = [0, 32], sizes = [8, 32], strides = [1, 1]} : vector<8x96xf32> to vector<8x32xf32>
    %77 = arith.addf %75, %76 : vector<8x32xf32>
    %78 = arith.negf %77 : vector<8x32xf32>
    %79 = math.exp %78 : vector<8x32xf32>
    %cst_13 = arith.constant 1.000000e+00 : f32
    %80 = vector.broadcast %cst_13 : f32 to vector<8x32xf32>
    %81 = arith.addf %80, %79 : vector<8x32xf32>
    %82 = arith.divf %80, %81 : vector<8x32xf32>
    %83 = vector.extract_strided_slice %59 {offsets = [0, 64], sizes = [8, 32], strides = [1, 1]} : vector<8x96xf32> to vector<8x32xf32>
    %84 = vector.extract_strided_slice %66 {offsets = [0, 64], sizes = [8, 32], strides = [1, 1]} : vector<8x96xf32> to vector<8x32xf32>
    %85 = arith.mulf %74, %84 : vector<8x32xf32>
    %86 = arith.addf %83, %85 : vector<8x32xf32>
    %87 = math.tanh %86 : vector<8x32xf32>
    %cst_14 = arith.constant 1.000000e+00 : f32
    %88 = vector.broadcast %cst_14 : f32 to vector<8x32xf32>
    %89 = arith.subf %88, %82 : vector<8x32xf32>
    %90 = arith.mulf %89, %87 : vector<8x32xf32>
    %91 = arith.mulf %82, %60 : vector<8x32xf32>
    %92 = arith.addf %90, %91 : vector<8x32xf32>
    %c0_15 = arith.constant 0 : index
    %c0_16 = arith.constant 0 : index
    %93 = vector.load %arg9[%c0_15, %c0_16] : memref<8x32xf32, #tpu.memory_space<vmem>>, vector<8x32xf32>
    tpu.vector_store %arg9[%c0_15, %c0_16], %92 {strides = array<i32>} : memref<8x32xf32, #tpu.memory_space<vmem>>, vector<8x32xf32>,
    %94 = arith.truncf %92 : vector<8x32xf32> to vector<8x32xbf16>
    %c0_17 = arith.constant 0 : index
    %c0_18 = arith.constant 0 : index
    %95 = vector.load %arg6[%c0_17, %c0_18] : memref<32x128xbf16, #tpu.memory_space<vmem>>, vector<32x128xbf16>
    %cst_19 = arith.constant dense<0.000000e+00> : vector<8x128xf32>
    %96 = tpu.matmul %94, %95, %cst_19 {dimension_numbers = #tpu.dot_dimension_numbers<[1], [0], [0], [1], [0, 0, 1, 1], [], []>} : vector<8x32xbf16>, vector<32x128xbf16>, vector<8x128xf32> -> vector<8x128xf32>
    %c0_20 = arith.constant 0 : index
    %c0_21 = arith.constant 0 : index
    %97 = vector.load %arg7[%c0_20, %c0_21] : memref<1x128xf32, #tpu.memory_space<vmem>>, vector<1x128xf32>
    %98 = vector.broadcast %97 : vector<1x128xf32> to vector<8x128xf32>
    %99 = arith.addf %96, %98 : vector<8x128xf32>
    %c0_22 = arith.constant 0 : index
    %c0_23 = arith.constant 0 : index
    %c0_24 = arith.constant 0 : index
    %100 = vector.load %arg8[%c0_22, %c0_23, %c0_24] : memref<1x8x128xf32, #tpu.memory_space<vmem>>, vector<1x8x128xf32>
    %101 = vector.shape_cast %100 : vector<1x8x128xf32> to vector<8x128xf32>
    %102 = vector.shape_cast %99 : vector<8x128xf32> to vector<1x8x128xf32>
    tpu.vector_store %arg8[%c0_22, %c0_23, %c0_24], %102 {strides = array<i32>} : memref<1x8x128xf32, #tpu.memory_space<vmem>>, vector<1x8x128xf32>,
    return
  }
  func.func @transform_0(%arg0: i32, %arg1: memref<8x8xi32, #tpu.memory_space<smem>>) -> (i32, i32) {
    %c0_i32 = arith.constant 0 : i32
    %c0_i32_0 = arith.constant 0 : i32
    %c0_i32_1 = arith.constant 0 : i32
    return %c0_i32, %c0_i32_0 : i32, i32
  }
  func.func @transform_1(%arg0: i32, %arg1: memref<8x8xi32, #tpu.memory_space<smem>>) -> (i32, i32) {
    %c0_i32 = arith.constant 0 : i32
    %c0_i32_0 = arith.constant 0 : i32
    %c0_i32_1 = arith.constant 0 : i32
    return %c0_i32, %c0_i32_0 : i32, i32
  }
  func.func @transform_2(%arg0: i32, %arg1: memref<8x8xi32, #tpu.memory_space<smem>>) -> (i32, i32) {
    %c0_i32 = arith.constant 0 : i32
    %c0_i32_0 = arith.constant 0 : i32
    %c0_i32_1 = arith.constant 0 : i32
    return %c0_i32, %c0_i32_0 : i32, i32
  }
  func.func @transform_3(%arg0: i32, %arg1: memref<8x8xi32, #tpu.memory_space<smem>>) -> (i32, i32) {
    %c0_i32 = arith.constant 0 : i32
    %c0_i32_0 = arith.constant 0 : i32
    %c0_i32_1 = arith.constant 0 : i32
    return %c0_i32, %c0_i32_0 : i32, i32
  }
  func.func @transform_4(%arg0: i32, %arg1: memref<8x8xi32, #tpu.memory_space<smem>>) -> (i32, i32) {
    %c0_i32 = arith.constant 0 : i32
    %c0_i32_0 = arith.constant 0 : i32
    %c0_i32_1 = arith.constant 0 : i32
    return %c0_i32, %c0_i32_0 : i32, i32
  }
  func.func @transform_5(%arg0: i32, %arg1: memref<8x8xi32, #tpu.memory_space<smem>>) -> (i32, i32) {
    %c0_i32 = arith.constant 0 : i32
    %c0_i32_0 = arith.constant 0 : i32
    %c0_i32_1 = arith.constant 0 : i32
    return %c0_i32, %c0_i32_0 : i32, i32
  }
  func.func @transform_6(%arg0: i32, %arg1: memref<8x8xi32, #tpu.memory_space<smem>>) -> (i32, i32, i32) {
    %c0_i32 = arith.constant 0 : i32
    %c0_i32_0 = arith.constant 0 : i32
    %c0_i32_1 = arith.constant 0 : i32
    return %arg0, %c0_i32, %c0_i32_0 : i32, i32, i32
  }
  func.func @transform_7(%arg0: i32, %arg1: memref<8x8xi32, #tpu.memory_space<smem>>) -> (i32, i32) {
    %c0_i32 = arith.constant 0 : i32
    %c0_i32_0 = arith.constant 0 : i32
    %c0_i32_1 = arith.constant 0 : i32
    return %c0_i32, %c0_i32_0 : i32, i32
  }
}

</mosaic_0001>

<bundles_post_ra>
// kernel: tpu_custom_call.1
= control target key start
LH: loop header
LB: loop body
LE: loop exit
PB: predicated region body
PF: predicated region fallthrough
CT: control target
= control target key end

     0   :  { %s1058_s30 = smov [#allocation3]   ;;  %s1297_s0 = inlined_call_operand.hbm [shape: s32[8,8], index: 0, kind: input, shape index: {}]   ;;  %s1298_s1 = inlined_call_operand.hbm [shape: f32[8,32], index: 1, kind: input, shape index: {}]   ;;  %s1299_s2 = inlined_call_operand.hbm [shape: f32[16,96], index: 2, kind: input, shape index: {}]   ;;  %s1300_s3 = inlined_call_operand.hbm [shape: bf16[32,96], index: 3, kind: input, shape index: {}]   ;;  %s1301_s4 = inlined_call_operand.vmem [shape: f32[1,96], index: 4, kind: input, shape index: {}]   ;;  %s1302_s5 = inlined_call_operand.hbm [shape: bf16[32,128], index: 5, kind: input, shape index: {}]   ;;  %s1303_s6 = inlined_call_operand.vmem [shape: f32[1,128], index: 6, kind: input, shape index: {}]   ;;  %s1304_s7 = inlined_call_operand.hbm [shape: f32[8,8,128], index: 7, kind: output, shape index: {0}]   ;;  %s1305_s8 = inlined_call_operand.hbm [shape: f32[8,32], index: 8, kind: output, shape index: {1}]  }
   0x1   :  { %1307 = sst [smem:[#allocation23_spill]] %s1298_s1  ;;  %s15_s29 = sshll.u32 %s1297_s0, 4  ;;  %s16_s29 = int_to_ptr.hbm [resolvable:$true] %s15_s29 }
   0x2   :  { %1308 = sst [smem:[#allocation24_spill]] %s1299_s2 }
   0x3   :  { %18 = dma.hbm_to_smem %s16_s29, 128, %s1058_s30, [#allocation2] }
   0x4   :  { %1020 = dma.done.wait [#allocation2], 128 }
   0x5   :  { %1021 = vsyncadd [#allocation2], 4294967168 }
   0x6   :  { %21 = sfence }
   0x7   :  { %22 = vsyncpa [#allocation5], 0 }
   0x8   :  { %23 = vsyncpa [#allocation8], 0 }
   0x9   :  { %24 = vsyncpa [#allocation11], 0 }
   0xa   :  { %25 = vsyncpa [#allocation6], 0 }
   0xb   :  { %27 = vsyncpa [#allocation6 + $0x1], 0 }
   0xc   :  { %28 = vsyncpa [#allocation14], 0  ;;  %s1120_s9 = smov 0   ;;  %s1122_s10 = smov 0  }
   0xd   :  { %s1124_s11 = smov 0   ;;  %s1126_s12 = smov 0  }
   0xe LB: > { %1309 = sst [smem:[#allocation21_spill]] %s1052_s11  ;;  %s1141_s0 = sadd.s32 4294967295, %s1056_s12   ;;  %s1056_s12 = sphi %s1126_s12, %s1321_s12   ;;  %s1052_s11 = sphi %s1124_s11, %s1318_s11   ;;  %s1048_s10 = sphi %s1122_s10, %s1320_s10   ;;  %s1044_s9 = sphi %s1120_s9, %s1319_s9  }
   0xf   : > { %s667_s13 = sadd.s32 4294967294, %s1056_s12   ;;  %s1145_s14 = sadd.s32 1, %s1056_s12  }
  0x10   : > { %s167_s15 = sadd.s32 1, %s1052_s11  ;;  %s164_s16 = ssub.s32 %s1056_s12, %s1145_s14 }
  0x11   : > { %p177_p0 = scmp.ne.s32.totalorder %s1052_s11, %s1048_s10  ;;  %p165_p1 = scmp.eq.s32.totalorder %s164_s16, 0 }
  0x12   : > { %p178_p2 = scmp.eq.s32.totalorder %s1141_s0, 7  ;;  %p183_p3 = scmp.ne.s32.totalorder %s1048_s10, %s1044_s9 }
  0x13   : > { %p184_p4 = scmp.eq.s32.totalorder %s667_s13, 7  ;;  %p668_p7 = scmp.ge.s32.totalorder %s1056_s12, 1 }
  0x14   : > { %s1156_s17 = scalar_select %p165_p1, %s1052_s11, %s167_s15  }
  0x15   : > { %p1160_p5 = por %p178_p2, %p177_p0  ;;  %p1164_p6 = por %p184_p4, %p183_p3 }
  0x16   : > { %1310 = sst [smem:[#allocation22_spill]] %s1156_s17  ;;  %p212_p8 = scmp.lt.s32.totalorder %s1056_s12, 9 }
  0x17   : > { %p669_p9 = scmp.ne.s32.totalorder %s1141_s0, 0  ;;  %p751_p10 = scmp.eq.s32.totalorder %s1141_s0, 0 }
  0x18   : > { %p1172_p11 = pnand %p668_p7, %p212_p8  ;;  %s1314_s2 = sld [smem:[#allocation24_spill]] }
  0x19   : > { %s1059_s24 = smov [#allocation7]   ;;  %s1316_s1 = sld [smem:[#allocation23_spill]] }
  0x1a   : > { %p734_p12 = pneg %p1172_p11  ;;  %s237_s25 = sshll.u32 %s1059_s24, 4  ;;  %s238_s25 = int_to_ptr.vmem [resolvable:$true] %s237_s25 }
  0x1b   : > { %s1060_s30 = smov 128   ;;  %s1061_s13 = smov 8  }
  0x1c   : > { %p1183_p13 = pnand %p751_p10, %p734_p12  ;;  %s1062_s15 = smov [#allocation4]  }
  0x1d   : > { %s226_s16 = sshll.u32 %s1062_s15, 4  ;;  %s249_s24 = sshll.u32 %s1300_s3, 4  ;;  %s227_s16 = int_to_ptr.vmem [resolvable:$true] %s226_s16  ;;  %s250_s24 = int_to_ptr.hbm [resolvable:$true] %s249_s24 }
  0x1e   : > { %s235_s23 = sshll.u32 %s1314_s2, 4  ;;  %s1063_s27 = smov [#allocation9]   ;;  %s236_s23 = int_to_ptr.hbm [resolvable:$true] %s235_s23 }
  0x1f   : > { %s224_s29 = sshll.u32 %s1316_s1, 4  ;;  %s251_s28 = sshll.u32 %s1063_s27, 4  ;;  %s225_s29 = int_to_ptr.hbm [resolvable:$true] %s224_s29  ;;  %s252_s28 = int_to_ptr.vmem [resolvable:$true] %s251_s28 }
  0x20   : > { %740 = dma.hbm_to_vmem [thread:$0]  (!%p1183_p13), %s236_s23, 256, %s238_s25, [#allocation8], %s1060_s30, %s1060_s30, %s1061_s13  }
  0x21   : > { %737 = dma.hbm_to_vmem [thread:$0]  (!%p1183_p13), %s225_s29, 128, %s227_s16, [#allocation5]  }
  0x22   : > { %s266_s17 = sshll.u32 %s1302_s5, 4  ;;  %s1064_s11 = smov 64   ;;  %s267_s17 = int_to_ptr.hbm [resolvable:$true] %s266_s17 }
  0x23   : > { %s1065_s23 = smov 4   ;;  %s1066_s25 = smov [#allocation10]  }
  0x24   : > { %743 = dma.hbm_to_vmem [thread:$0]  (!%p1183_p13), %s250_s24, 256, %s252_s28, [#allocation8], %s1064_s11, %s1064_s11, %s1065_s23  }
  0x25   : > { %s268_s30 = sshll.u32 %s1066_s25, 4  ;;  %287 = sbr.rel (%p1172_p11) target bundleno = 794 (0x31a), region = 44  ;;  %s269_s30 = int_to_ptr.vmem [resolvable:$true] %s268_s30 }
  0x26   : > { %746 = dma.hbm_to_vmem [thread:$0]  (!%p1183_p13), %s267_s17, 256, %s269_s30, [#allocation11], %s1064_s11, %s1064_s11, %s1065_s23  }
  0x2a   : > { %1023 = dma.done.wait (%p751_p10), [#allocation5], 128  }
  0x2b   : > { %1025 = vsyncadd (%p751_p10), [#allocation5], 4294967168 }
  0x2c   : > { %1027 = dma.done.wait (%p751_p10), [#allocation8], 512  }
  0x2d   : > { %1029 = vsyncadd (%p751_p10), [#allocation8], 4294966784 }
  0x2e   : > { %1031 = dma.done.wait (%p751_p10), [#allocation11], 256  }
  0x2f   : > { %1033 = vsyncadd (%p751_p10), [#allocation11], 4294967040  ;;  %s325_s1 = sand.u32 1, %s1048_s10   ;;  %334 = sbr.rel (%p669_p9) target bundleno = 54 (0x36), region = 64 }
  0x30   : > { %s1221_s2 = sshll.u32 %s325_s1, 3 }
  0x31   : > { %s327_s11 = scalar_lea.vmem [#allocation12], %s1221_s2 }
  0x34   : > { %v335_v0 = vld [vmem:[#allocation4] sm:$0xff]  ;;  %vm336_vm0 = vcmask 261120  }
  0x35   : > { %337 = vst.msk [vmem:[#allocation13] sm:$0xff] %vm336_vm0, %v335_v0 }
  0x36 PF: > { %v709_v1 = vld [vmem:[#allocation9 + $0x8] sm:$0xff]  ;;  %v338_v2 = vlaneseq  ;;  %s1227_s17 = sshll.u32 %s1141_s0, 7  ;;  %v708_v3 = vld [vmem:[#allocation9] sm:$0xff]  ;;  %v386_v4 = vld [vmem:[#allocation7 + $0x8] sm:$0xff]  ;;  %vm433_vm2 = vcmask 261120   ;;  %vm387_vm10 = vcmask 130048  }
  0x37   : > { %v385_v5 = vld [vmem:[#allocation7] sm:$0xff]  ;;  %s342_s20 = sld [smem:[#allocation3 + %s1227_s17]]  ;;  %s346_s26 = sadd.s32 1, %s1227_s17  ;;  %443 = vmatpush.bf16.msra.mxu1 %v709_v1  ;;  %405 = vmatpush.msra.mxu0 %v386_v4  ;;  %v1067_v26 = vmov 0.0   ;;  %v808_v28 = vld [vmem:[%s1301_s4] ss:$0 sm:$0xff] }
  0x38   : > { %v339_v7 = vshrl.u32 %v338_v2, 7  ;;  %s347_s29 = sld [smem:[#allocation3 + %s346_s26]]  ;;  %s351_s13 = sadd.s32 2, %s1227_s17  ;;  %v381_v20 = vand.u32 127, %v338_v2  ;;  %v711_v52 = vld [vmem:[#allocation10 + $0x8] sm:$0xff]  ;;  %v710_v53 = vld [vmem:[#allocation10] sm:$0xff] }
  0x39   : > { %s352_s15 = sld [smem:[#allocation3 + %s351_s13]]  ;;  %s356_s16 = sadd.s32 3, %s1227_s17  ;;  %406 = vmatpush.msra.mxu0 %v385_v5  ;;  %531 = vmatpush.bf16.msra.mxu2 %v711_v52  ;;  %v809_v63 = vld [vmem:[%s1303_s6] ss:$0 sm:$0xff] }
  0x3a   : > { %s357_s21 = sld [smem:[#allocation3 + %s356_s16]]  ;;  %s361_s22 = sadd.s32 4, %s1227_s17  ;;  %vm340_vm1 = vcmp.eq.s32.totalorder %v339_v7, 0  ;;  %vm345_vm3 = vcmp.eq.s32.totalorder %v339_v7, 1  ;;  %vm350_vm4 = vcmp.eq.s32.totalorder %v339_v7, 2  ;;  %vm355_vm5 = vcmp.eq.s32.totalorder %v339_v7, 3 }
  0x3b   : > { %s362_s24 = sld [smem:[#allocation3 + %s361_s22]]  ;;  %s366_s27 = sadd.s32 5, %s1227_s17  ;;  %444 = vmatpush.bf16.msra.mxu1 %v708_v3  ;;  %vm360_vm6 = vcmp.eq.s32.totalorder %v339_v7, 4  ;;  %vm365_vm7 = vcmp.eq.s32.totalorder %v339_v7, 5  ;;  %vm370_vm8 = vcmp.eq.s32.totalorder %v339_v7, 6  ;;  %vm375_vm9 = vcmp.eq.s32.totalorder %v339_v7, 7 }
  0x3c   : > { %v1231_v6 = vld [vmem:[#allocation13] sm:$0xff]  ;;  %s367_s28 = sld [smem:[#allocation3 + %s366_s27]]  ;;  %s371_s23 = sadd.s32 6, %s1227_s17 }
  0x3d   : > { %v412_v8 = vpack.c.bf16 %v1231_v6, %v1231_v6  ;;  %v343_v9 = vstv %s342_s20  ;;  %s372_s25 = sld [smem:[#allocation3 + %s371_s23]]  ;;  %s376_s30 = sadd.s32 7, %s1227_s17  ;;  %532 = vmatpush.bf16.msra.mxu2 %v710_v53 }
  0x3e   : > { %v344_v10 = vsel %vm340_vm1, %v343_v9, 0  ;;  %v348_v11 = vstv %s347_s29  ;;  %s377_s26 = sld [smem:[#allocation3 + %s376_s30]]  ;;  %s1068_s29 = smov 64  }
  0x3f   : > { %691 = vmatmul.msk.bf16.vlgmr.msra.gmra.mxu1 %vm433_vm2, %v412_v8  ;;  %v349_v12 = vsel %vm345_vm3, %v348_v11, %v344_v10  ;;  %v353_v13 = vstv %s352_s15  ;;  %s1069_s13 = smov 96   ;;  %s1070_s15 = smov 32  }
  0x40   : > { %v354_v14 = vsel %vm350_vm4, %v353_v13, %v349_v12  ;;  %v358_v15 = vstv %s357_s21  ;;  %s1071_s16 = smov [#allocation13]   ;;  %s566_s27 = sshll.u32 %s1305_s8, 4  ;;  %s567_s27 = int_to_ptr.hbm [resolvable:$true] %s566_s27 }
  0x41   : > { %v359_v16 = vsel %vm355_vm5, %v358_v15, %v354_v14  ;;  %v363_v17 = vstv %s362_s24  ;;  %s564_s21 = sshll.u32 %s1071_s16, 4  ;;  %s552_s20 = sshll.u32 %s327_s11, 4  ;;  %s565_s21 = int_to_ptr.vmem [resolvable:$true] %s564_s21  ;;  %s553_s20 = int_to_ptr.vmem [resolvable:$true] %s552_s20 }
  0x42   : > { %v364_v18 = vsel %vm360_vm6, %v363_v17, %v359_v16  ;;  %v368_v19 = vstv %s367_s28  ;;  %s703_s28 = sshll.u32 %s1141_s0, 3  ;;  %s996_s24 = scalar_lea.hbm %s1304_s7, 64 }
  0x43   : > { %v369_v21 = vsel %vm365_vm7, %v368_v19, %v364_v18  ;;  %v373_v22 = vstv %s372_s25  ;;  %s550_s30 = scalar_lea.hbm %s1304_s7, %s703_s28 }
  0x44   : > { %v374_v23 = vsel %vm370_vm8, %v373_v22, %v369_v21  ;;  %v378_v24 = vstv %s377_s26 }
  0x45   : > { %v379_v25 = vsel %vm375_vm9, %v378_v24, %v374_v23 }
  0x46   : > { %vm382_vm11 = vcmp.eq.s32.totalorder %v381_v20, %v379_v25 }
  0x47   : > { %v681_v27 = vsel %vm382_vm11, 1.0, %v1067_v26 }
  0x48   : > { %682 = vmatmul.msk.f32.vlgmr.msra.gmra.mxu0 %vm387_vm10, %v681_v27 }
  0xbc   : > { %v446_v29 = vpop.f32.mrf.mxu1 }
  0xbd   : > { %v447_v30 = vadd.f32 %v808_v28, %v446_v29 }
  0xbf   : > { %471 = vrot.lane.b32.xlu0 %v447_v30, %s1068_s29 }
  0xc4   : > { %v448_v31 = vpop.f32.mrf.mxu1 }
  0xc5   : > { %v408_v32 = vpop.f32.mrf.mxu0 }
  0xc6   : > { %v450_v33 = vadd.f32 %v447_v30, %v408_v32 }
  0xc8   : > { %v692_v34 = vmul.f32 -1.442695, %v450_v33 }
  0xca   : > { %810 = vpow2.f32 %v692_v34 }
  0xd0   : > { %v811_v35 = vpop.eup %810 }
  0xd1   : > { %v454_v36 = vadd.f32 1.0, %v811_v35 }
  0xd3   : > { %812 = vrcp.f32 %v454_v36  ;;  %v466_v42 = vand.u32 2147483648, %v454_v36  ;;  %vm460_vm13 = vweird.f32 %v454_v36  ;;  %v464_v43 = vand.u32 2147483647, %v454_v36 }
  0xd5   : > { %v467_v45 = vor.u32 1.1754944e-38, %v466_v42  ;;  %vm465_vm15 = vcmp.eq.f32.partialorder %v464_v43, 8.507059e+37 }
  0xd9   : > { %v813_v37 = vpop.eup %812 }
  0xda   : > { %v456_v38 = vmul.f32 %v813_v37, %v454_v36  ;;  %vm461_vm12 = vweird.f32 %v813_v37 }
  0xdb   : > { %vm462_vm14 = vmor %vm460_vm13, %vm461_vm12 }
  0xdc   : > { %v457_v39 = vsub.f32 1.0, %v456_v38 }
  0xde   : > { %v458_v40 = vmul.f32 %v813_v37, %v457_v39 }
  0xe0   : > { %v459_v41 = vadd.f32 %v813_v37, %v458_v40 }
  0xe2   : > { %v463_v44 = vsel %vm462_vm14, %v813_v37, %v459_v41 }
  0xe3   : > { %v468_v47 = vsel %vm465_vm15, %v467_v45, %v463_v44 }
  0xe4   : > { %v481_v55 = vsub.f32 1.0, %v468_v47 }
 0x131   : > { %v472_v46 = vpop.permute.xlu0 %471 }
 0x132   : > { %v474_v48 = vmul.f32 %v472_v46, %v468_v47 }
 0x134   : > { %476 = vrot.lane.b32.xlu0 %v474_v48, %s1068_s29  ;;  %s554_s29 = sshll.u32 %s550_s30, 4  ;;  %s555_s29 = int_to_ptr.hbm [resolvable:$true] %s554_s29 }
 0x1a6   : > { %v477_v49 = vpop.permute.xlu0 %476 }
 0x1a7   : > { %v479_v50 = vadd.f32 %v477_v49, %v408_v32 }
 0x1a9   : > { %814 = vtanh.f32 %v479_v50 }
 0x1af   : > { %v815_v51 = vpop.eup %814 }
 0x1b0   : > { %483 = vrot.lane.b32.xlu1 %v815_v51, %s1069_s13 }
 0x1b8   : > { %488 = vrot.lane.b32.xlu1 %v1231_v6, %s1070_s15  ;;  %s990_s15 = sshra.s32 %s555_s29, 4  ;;  %s991_s15 = int_to_ptr.hbm [resolvable:$true] %s990_s15 }
 0x1b9   : > { %s992_s16 = scalar_lea.hbm %s991_s15, 8  ;;  %p997_p4 = scmp.lt.s32.totalorder %s991_s15, %s1304_s7 }
 0x1ba   : > { %p993_p0 = scmp.ne.s32.totalorder %s991_s15, %s992_s16  ;;  %p998_p7 = scmp.lt.s32.totalorder %s996_s24, %s992_s16 }
 0x1bc   : > { %p994_p1 = pnand %p993_p0, %p1160_p5  ;;  %p999_p8 = por %p998_p7, %p997_p4 }
 0x1be   : > { %p995_p3 = pneg %p994_p1 }
 0x1c0   : > { %p1000_p9 = pnand %p999_p8, %p995_p3 }
 0x222   : > { %v484_v54 = vpop.permute.xlu1 %483 }
 0x223   : > { %v486_v57 = vmul.f32 %v484_v54, %v481_v55 }
 0x22a   : > { %v489_v56 = vpop.permute.xlu1 %488 }
 0x22b   : > { %v491_v58 = vmul.f32 %v489_v56, %v468_v47 }
 0x22d   : > { %v492_v59 = vadd.f32 %v491_v58, %v486_v57 }
 0x22f   : > { %v498_v60 = vpack.c.bf16 %v492_v59, %v492_v59 }
 0x231   : > { %508 = vrot.lane.b32.xlu2 %v498_v60, %s1069_s13 }
 0x239   : > { %494 = vrot.lane.b32.xlu2 %v492_v59, %s1069_s13  ;;  %s540_s13 = scalar_lea.sflag [#allocation6], %s325_s1 }
 0x28b   : > { %v509_v61 = vpop.permute.xlu2 %508 }
 0x28c   : > { %701 = vmatmul.msk.bf16.vlgmr.msra.gmra.mxu2 %vm433_vm2, %v509_v61 }
 0x293   : > { %v495_v62 = vpop.permute.xlu2 %494 }
 0x294   : > { %497 = vst.msk [vmem:[#allocation13] sm:$0xff] %vm433_vm2, %v495_v62 }
 0x295   : > { %730 = dma.vmem_to_hbm [thread:$0]  (%p178_p2), %s565_s21, 128, %s567_s27, [#allocation14]  }
 0x30f   : > { %v534_v0 = vpop.f32.mrf.mxu2 }
 0x310   : > { %v535_v1 = vadd.f32 %v809_v63, %v534_v0 }
 0x312   : > { %538 = vst [vmem:[%s327_s11] sm:$0xff] %v535_v1 }
 0x313   : > { %1003 = shalt.err (!%p1000_p9)
}
 0x314   : > { %728 = dma.vmem_to_hbm [thread:$0]  (%p1160_p5), %s553_s20, 128, %s555_s29, %s540_s13  }
 0x317   : > { %v536_v2 = vpop.f32.mrf.mxu2 }
 0x318   : > { %1035 = dma.done.wait (%p178_p2), [#allocation14], 128  }
 0x319   : > { %1037 = vsyncadd (%p178_p2), [#allocation14], 4294967168 }
 0x31a PF: > { %p761_p10 = scmp.ge.s32.totalorder %s1056_s12, 2  ;;  %s583_s1 = sand.u32 1, %s1044_s9  }
 0x31b   : > { %s584_s2 = scalar_lea.sflag [#allocation6], %s583_s1 }
 0x31c   : > { %p748_p11 = pnand %p761_p10, %p1164_p6 }
 0x31e   : > { %p749_p12 = pneg %p748_p11 }
 0x320   : > { %1039 = dma.done.wait (%p749_p12), %s584_s2, 128  }
 0x321   : > { %1041 = vsyncadd (%p749_p12), %s584_s2, 4294967168  ;;  %s1317_s18 = sld [smem:[#allocation21_spill]]  ;;  %p31_p5 = scmp.ge.s32.totalorder %s1145_s14, 10  }
 0x322   : > { %s1318_s11 = sld [smem:[#allocation22_spill]]  ;;  %s1319_s9 = smov %s1048_s10 }
 0x323   : > { %s1321_s12 = smov %s1145_s14  ;;  %33 = sbr.rel (!%p31_p5) target bundleno = 14 (0xe), region = 105 }
 0x327   : > { %s1320_s10 = smov %s1317_s18 }
 0x328   :  { %590 = vsyncpa [#allocation5], 1 }
 0x329   :  { %592 = vsyncpa [#allocation5 + $0x1], 1 }
 0x32a   :  { %593 = vsyncpa [#allocation8], 1 }
 0x32b   :  { %594 = vsyncpa [#allocation11], 1 }
 0x32c   :  { %595 = vsyncpa [#allocation6], 1 }
 0x32d   :  { %597 = vsyncpa [#allocation6 + $0x1], 1 }
 0x32e   :  { %598 = vsyncpa [#allocation14], 1 }

</bundles_post_ra>
